<compile_context>
chip_gen: v7x
topology: tpu7x:2x2x1
jax: 0.10.0
libtpu: 0.0.40
codegen_flags: <defaults>
</compile_context>

<pallas_src>
import jax
import jax.numpy as jnp
from jax.experimental import pallas as pl
from jax.experimental.pallas import tpu as pltpu

EPS = 1e-5
_F32 = 4  # bytes; budgets sized for f32 streaming (conservative for bf16)


def _vmem_limit_bytes():
    """Scoped VMEM limit from physical capacity (v5e/v6e 128 MiB, v7x 64 MiB)."""
    phys = 64 * 1024 * 1024  # conservative default = v7x per-TensorCore VMEM
    try:
        phys = int(getattr(pltpu.get_tpu_info(), "vmem_capacity_bytes", phys))
    except Exception:
        pass
    # Keep ~1/4 of physical as headroom; never request more than 64 MiB scoped.
    return max(32 * 1024 * 1024, min(phys * 3 // 4, 64 * 1024 * 1024))


def _pick_tiles(nc, hw, budget_bytes, row_cap=None):
    """Pick a (TR, TW) tile: lane-dense, <= budget, (8,128)-legal, cdiv grid."""
    min_tr = nc if nc < 8 else 8                    # rows: multiple of 8, or full dim
    max_tw = max(128, budget_bytes // (min_tr * _F32))
    if hw <= max_tw:
        tw = hw                                     # full row (always legal)
    else:
        tw = (max_tw // 128) * 128                  # largest lane-dense multiple of 128
    max_tr = max(min_tr, budget_bytes // (tw * _F32))
    tr = nc if nc <= max_tr else max(min_tr, (max_tr // 8) * 8)
    if row_cap is not None and nc >= 16:
        tr = min(tr, row_cap)                       # keep >=2 row tiles (v7x megacore)
    return tr, tw


def _make_stats_kernel(tr, tw, hw, ragged):
    def kernel(x_ref, sum_ref, sq_ref):
        # Per-row partial sums; accumulator block persists in VMEM across k.
        @pl.when(pl.program_id(1) == 0)
        def _():
            sum_ref[...] = jnp.zeros_like(sum_ref)
            sq_ref[...] = jnp.zeros_like(sq_ref)

        x = x_ref[...].astype(jnp.float32)          # (TR, TW)
        if ragged:                                  # mask the ragged lane tail only
            k = pl.program_id(1)
            col = jax.lax.broadcasted_iota(jnp.int32, (tr, tw), 1)
            x = jnp.where(col < (hw - k * tw), x, 0.0)
        sum_ref[...] += jnp.sum(x, axis=1, keepdims=True)
        sq_ref[...] += jnp.sum(x * x, axis=1, keepdims=True)

    return kernel


def _norm_kernel(x_ref, a_ref, b_ref, o_ref):
    # Folded affine: y = x * a + b (2 VPU ops / element), lane-dense store.
    x = x_ref[...].astype(jnp.float32)
    o_ref[...] = (x * a_ref[...] + b_ref[...]).astype(o_ref.dtype)


def batchnorm2d(x_nchw, gamma, beta, eps=EPS):
    """Training-mode BatchNorm2d forward. x: (N,C,H,W); gamma, beta: (C,)."""
    N, C, H, W = x_nchw.shape
    HW = H * W
    NC = N * C
    x2 = x_nchw.reshape(NC, HW)                     # free reshape (N, C adjacent)

    vmem_limit = _vmem_limit_bytes()
    # pass 1 double-buffers only the input tile; pass 2 also the output tile.
    budget1 = min(vmem_limit // 3, 16 * 1024 * 1024)
    budget2 = min(vmem_limit // 5, 10 * 1024 * 1024)

    # ---- pass 1: per-(n,c) row sum / sum-of-squares --------------------------
    row_cap = ((NC + 1) // 2 + 7) // 8 * 8          # force >= 2 row tiles when NC >= 16
    tr1, tw1 = _pick_tiles(NC, HW, budget1, row_cap=row_cap)
    grid1 = (pl.cdiv(NC, tr1), pl.cdiv(HW, tw1))
    sums, sqs = pl.pallas_call(
        _make_stats_kernel(tr1, tw1, HW, ragged=(HW % tw1) != 0),
        out_shape=(jax.ShapeDtypeStruct((NC, 1), jnp.float32),
                   jax.ShapeDtypeStruct((NC, 1), jnp.float32)),
        grid=grid1,
        in_specs=[pl.BlockSpec((tr1, tw1), lambda r, k: (r, k))],
        out_specs=(pl.BlockSpec((tr1, 1), lambda r, k: (r, 0)),
                   pl.BlockSpec((tr1, 1), lambda r, k: (r, 0))),
        compiler_params=pltpu.CompilerParams(
            dimension_semantics=("parallel", "arbitrary"),
            vmem_limit_bytes=vmem_limit),
    )(x2)

    # O(N*C) scalar math: combine row partials, fold affine into per-row a, b.
    # TODO(synk): could be folded into a pass-1 epilogue to save one tiny XLA op.
    cnt = jnp.float32(N * HW)
    sum_c = jnp.sum(sums.reshape(N, C), axis=0)             # (C,)
    sq_c = jnp.sum(sqs.reshape(N, C), axis=0)               # (C,)
    mean = sum_c / cnt
    var = jnp.maximum(sq_c / cnt - mean * mean, 0.0)         # biased variance
    a_c = gamma.astype(jnp.float32) * jax.lax.rsqrt(var + eps)
    b_c = beta.astype(jnp.float32) - mean * a_c
    a = jnp.broadcast_to(a_c[None, :], (N, C)).reshape(NC, 1)
    b = jnp.broadcast_to(b_c[None, :], (N, C)).reshape(NC, 1)

    # ---- pass 2: y = x * a + b ------------------------------------------------
    tr2, tw2 = _pick_tiles(NC, HW, budget2)
    grid2 = (pl.cdiv(NC, tr2), pl.cdiv(HW, tw2))
    out2 = pl.pallas_call(
        _norm_kernel,
        out_shape=jax.ShapeDtypeStruct((NC, HW), x_nchw.dtype),
        grid=grid2,
        in_specs=[pl.BlockSpec((tr2, tw2), lambda r, k: (r, k)),
                  pl.BlockSpec((tr2, 1), lambda r, k: (r, 0)),
                  pl.BlockSpec((tr2, 1), lambda r, k: (r, 0))],
        out_specs=pl.BlockSpec((tr2, tw2), lambda r, k: (r, k)),
        compiler_params=pltpu.CompilerParams(
            dimension_semantics=("parallel", "parallel"),
            vmem_limit_bytes=vmem_limit),
    )(x2, a, b)

    # TODO(synk): running_mean / running_var EMA (stateful nn.Module buffers) is
    #             not materialized; forward output matches training-mode semantics.
    return out2.reshape(N, C, H, W)                 # free reshape back to NCHW


if __name__ == "__main__":
    key = jax.random.PRNGKey(0)
    N, C, H, W = 2, 4, 16, 16
    x = jax.random.normal(key, (N, C, H, W), dtype=jnp.float32)

    # Deterministic parameter init (PyTorch BatchNorm2d defaults).
    gamma = jnp.ones((C,), dtype=jnp.float32)
    beta = jnp.zeros((C,), dtype=jnp.float32)

    y = jax.block_until_ready(batchnorm2d(x, gamma, beta))

    # Reference (plain JAX) training-mode batchnorm.
    mean = jnp.mean(x, axis=(0, 2, 3), keepdims=True)
    var = jnp.mean((x - mean) ** 2, axis=(0, 2, 3), keepdims=True)
    ref = (x - mean) / jnp.sqrt(var + EPS) * gamma.reshape(1, C, 1, 1) \
          + beta.reshape(1, C, 1, 1)
    assert jnp.allclose(y, ref, atol=1e-4, rtol=1e-4), "mismatch vs reference"

    print("KERNEL_OK")
</pallas_src>

<mosaic_0001>
module attributes {stable_mosaic.version = 11 : i64} {
  func.func @kernel(%arg0: i32, %arg1: i32, %arg2: memref<8x256xf32, #tpu.memory_space<vmem>>, %arg3: memref<8x1xf32, #tpu.memory_space<vmem>>, %arg4: memref<8x1xf32, #tpu.memory_space<vmem>>) attributes {dimension_semantics = [#tpu.dimension_semantics<parallel>, #tpu.dimension_semantics<arbitrary>], iteration_bounds = array<i64: 1, 1>, scalar_prefetch = 0 : i64, scratch_operands = 0 : i64, tpu.core_type = #tpu.core_type<tc>, window_params = [{transform_indices = @transform_0, window_bounds = array<i64: 8, 256>}, {transform_indices = @transform_1, window_bounds = array<i64: 8, 1>}, {transform_indices = @transform_2, window_bounds = array<i64: 8, 1>}]} {
    %c0_i32 = arith.constant 0 : i32
    %0 = arith.cmpi eq, %arg1, %c0_i32 : i32
    %1 = arith.extui %0 : i1 to i32
    %c0_i32_0 = arith.constant 0 : i32
    %2 = arith.cmpi ne, %1, %c0_i32_0 : i32
    scf.if %2 {
      %cst_11 = arith.constant 0.000000e+00 : f32
      %15 = vector.broadcast %cst_11 : f32 to vector<8x1xf32>
      %c0_12 = arith.constant 0 : index
      %c0_13 = arith.constant 0 : index
      %16 = vector.load %arg3[%c0_12, %c0_13] : memref<8x1xf32, #tpu.memory_space<vmem>>, vector<8x1xf32>
      tpu.vector_store %arg3[%c0_12, %c0_13], %15 {strides = array<i32>} : memref<8x1xf32, #tpu.memory_space<vmem>>, vector<8x1xf32>,
      %cst_14 = arith.constant 0.000000e+00 : f32
      %17 = vector.broadcast %cst_14 : f32 to vector<8x1xf32>
      %c0_15 = arith.constant 0 : index
      %c0_16 = arith.constant 0 : index
      %18 = vector.load %arg4[%c0_15, %c0_16] : memref<8x1xf32, #tpu.memory_space<vmem>>, vector<8x1xf32>
      tpu.vector_store %arg4[%c0_15, %c0_16], %17 {strides = array<i32>} : memref<8x1xf32, #tpu.memory_space<vmem>>, vector<8x1xf32>,
    } else {
    }
    %c0 = arith.constant 0 : index
    %c0_1 = arith.constant 0 : index
    %3 = vector.load %arg2[%c0, %c0_1] : memref<8x256xf32, #tpu.memory_space<vmem>>, vector<8x256xf32>
    %c0_2 = arith.constant 0 : index
    %c0_3 = arith.constant 0 : index
    %4 = vector.load %arg3[%c0_2, %c0_3] : memref<8x1xf32, #tpu.memory_space<vmem>>, vector<8x1xf32>
    %cst = arith.constant dense<0.000000e+00> : vector<8xf32>
    %5 = vector.multi_reduction <add>, %3, %cst [1] : vector<8x256xf32> to vector<8xf32>
    %6 = vector.shape_cast %5 : vector<8xf32> to vector<8x1xf32>
    %7 = arith.addf %4, %6 : vector<8x1xf32>
    %c0_4 = arith.constant 0 : index
    %c0_5 = arith.constant 0 : index
    %8 = vector.load %arg3[%c0_4, %c0_5] : memref<8x1xf32, #tpu.memory_space<vmem>>, vector<8x1xf32>
    tpu.vector_store %arg3[%c0_4, %c0_5], %7 {strides = array<i32>} : memref<8x1xf32, #tpu.memory_space<vmem>>, vector<8x1xf32>,
    %c0_6 = arith.constant 0 : index
    %c0_7 = arith.constant 0 : index
    %9 = vector.load %arg4[%c0_6, %c0_7] : memref<8x1xf32, #tpu.memory_space<vmem>>, vector<8x1xf32>
    %10 = arith.mulf %3, %3 : vector<8x256xf32>
    %cst_8 = arith.constant dense<0.000000e+00> : vector<8xf32>
    %11 = vector.multi_reduction <add>, %10, %cst_8 [1] : vector<8x256xf32> to vector<8xf32>
    %12 = vector.shape_cast %11 : vector<8xf32> to vector<8x1xf32>
    %13 = arith.addf %9, %12 : vector<8x1xf32>
    %c0_9 = arith.constant 0 : index
    %c0_10 = arith.constant 0 : index
    %14 = vector.load %arg4[%c0_9, %c0_10] : memref<8x1xf32, #tpu.memory_space<vmem>>, vector<8x1xf32>
    tpu.vector_store %arg4[%c0_9, %c0_10], %13 {strides = array<i32>} : memref<8x1xf32, #tpu.memory_space<vmem>>, vector<8x1xf32>,
    return
  }
  func.func @transform_0(%arg0: i32, %arg1: i32) -> (i32, i32) {
    %c0_i32 = arith.constant 0 : i32
    return %arg0, %arg1 : i32, i32
  }
  func.func @transform_1(%arg0: i32, %arg1: i32) -> (i32, i32) {
    %c0_i32 = arith.constant 0 : i32
    %c0_i32_0 = arith.constant 0 : i32
    return %arg0, %c0_i32 : i32, i32
  }
  func.func @transform_2(%arg0: i32, %arg1: i32) -> (i32, i32) {
    %c0_i32 = arith.constant 0 : i32
    %c0_i32_0 = arith.constant 0 : i32
    return %arg0, %c0_i32 : i32, i32
  }
}

</mosaic_0001>

<bundles_post_ra>
// kernel: tpu_custom_call.1
= control target key start
LH: loop header
LB: loop body
LE: loop exit
PB: predicated region body
PF: predicated region fallthrough
CT: control target
= control target key end

     0   :  { %8 = vsyncpa [#allocation3], 0  ;;  %s81_s9 = smov [#allocation2]   ;;  %s132_s0 = inlined_call_operand.hbm [shape: f32[8,256], index: 0, kind: input, shape index: {}]   ;;  %s133_s1 = inlined_call_operand.vmem [shape: f32[8,1], index: 1, kind: output, shape index: {0}]   ;;  %s134_s2 = inlined_call_operand.vmem [shape: f32[8,1], index: 2, kind: output, shape index: {1}]  }
   0x1   :  { %s15_s10 = sshll.u32 %s81_s9, 4  ;;  %s57_s13 = scalar_lea.hbm %s132_s0, 256  ;;  %s16_s10 = int_to_ptr.vmem [resolvable:$true] %s15_s10 }
   0x2   :  { %p58_p0 = scmp.ne.s32.totalorder %s132_s0, %s57_s13  ;;  %p61_p1 = scmp.lt.u32.totalorder %s57_s13, %s132_s0 }
   0x4   :  { %p63_p2 = pnand %p61_p1, %p58_p0 }
   0x6   :  { %66 = shalt.err (!%p63_p2)
}
   0x7   :  { %s67_s18 = scalar_lea.vmem %s16_s10, 256  ;;  %p72_p4 = scmp.lt.s32.totalorder %s16_s10, %s16_s10 }
   0x8   :  { %p68_p3 = scmp.ne.s32.totalorder %s16_s10, %s67_s18  ;;  %p73_p5 = scmp.lt.s32.totalorder %s67_s18, %s67_s18 }
   0xa   :  { %p74_p6 = por %p73_p5, %p72_p4 }
   0xc   :  { %p75_p7 = pnand %p74_p6, %p68_p3 }
   0xe   :  { %78 = shalt.err (!%p75_p7)
}
   0xf   :  { %18 = dma.hbm_to_vmem [thread:$0]  %s132_s0, 256, %s16_s10, [#allocation3]  }
  0x10   :  { %79 = dma.done.wait [#allocation3], 256  }
  0x11   :  { %80 = vsyncadd [#allocation3], 4294967040  ;;  %vm26_vm0 = vcmask 7168   ;;  %v82_v0 = vmov 0.0   ;;  %v29_v1 = vld [vmem:[#allocation2] sm:$0xff]  ;;  %v30_v2 = vld [vmem:[#allocation2 + $0x8] sm:$0xff] }
  0x12   :  { %27 = vst.msk [vmem:[%s133_s1] sm:$0xff] %vm26_vm0, %v82_v0  ;;  %28 = vst.msk [vmem:[%s134_s2] sm:$0xff] %vm26_vm0, %v82_v0  ;;  %v32_v3 = vadd.f32 %v30_v2, %v29_v1  ;;  %v39_v4 = vmul.f32 %v29_v1, %v29_v1  ;;  %v40_v5 = vmul.f32 %v30_v2, %v30_v2 }
  0x14   :  { %33 = vadd.xlane.f32.xlu0 %v32_v3  ;;  %v41_v6 = vadd.f32 %v40_v5, %v39_v4 }
  0x18   :  { %42 = vadd.xlane.f32.xlu0 %v41_v6 }
  0x19   :  { %v31_v7 = vld [vmem:[%s133_s1] sm:$0xff] }
  0x1a   :  { %v38_v10 = vld [vmem:[%s134_s2] sm:$0xff] }
  0xa1   :  { %v34_v8 = vpop.xlane.xlu0 %33 }
  0xa2   :  { %v35_v9 = vadd.f32 %v34_v8, %v31_v7 }
  0xa4   :  { %37 = vst.msk [vmem:[%s133_s1] sm:$0xff] %vm26_vm0, %v35_v9 }
  0xa5   :  { %v43_v11 = vpop.xlane.xlu0 %42 }
  0xa6   :  { %v44_v12 = vadd.f32 %v43_v11, %v38_v10 }
  0xa8   :  { %45 = vst.msk [vmem:[%s134_s2] sm:$0xff] %vm26_vm0, %v44_v12 }
  0xa9   :  { %54 = vsyncpa [#allocation3], 1 }

</bundles_post_ra>
